<compile_context>
chip_gen: v5e
topology: v5e:2x2
jax: 0.10.0
libtpu: 0.0.40
codegen_flags: <defaults>
</compile_context>

<pallas_src>
import functools

import jax
import jax.numpy as jnp
from jax.experimental import pallas as pl
from jax.experimental.pallas import tpu as pltpu


_LANE_BLOCK = 128  # width of one graph-operator block (native MXU / vreg lanes)


def _gcn_kernel_conv_first(x_ref, w_ref, ab_ref, bias_ref, o_ref, *,
                           K, S, L, C_out_p):
    # x_ref:    (C_in, S*L)       bf16  lane-dense slab (Tt frames x Vp nodes)
    # w_ref:    (K*C_out_p, C_in) bf16  fused 1x1-conv weights (all K branches)
    # ab_ref:   (K, L, L)         bf16  per-k graph block kron(I_{L//Vp}, A_k)
    # bias_ref: (C_out_p, L)      f32   bias folded through A, tiled per block
    # o_ref:    (C_out_p, S*L)    f32
    # One big MXU push for the pointwise conv of all K branches at once.
    y_all = jnp.dot(w_ref[...], x_ref[...],
                    preferred_element_type=jnp.float32)        # (K*C_out_p, S*L)
    bias = bias_ref[...]
    for s in range(S):                        # static 128-lane slices (free views)
        acc = bias
        for k in range(K):                    # K is tiny (2-3): unrolled
            yk = y_all[k * C_out_p:(k + 1) * C_out_p,
                       s * L:(s + 1) * L].astype(jnp.bfloat16)
            acc = acc + jnp.dot(yk, ab_ref[k],
                                preferred_element_type=jnp.float32)
        o_ref[:, s * L:(s + 1) * L] = acc


def _gcn_kernel_graph_first(x_ref, w_ref, ab_ref, bias_ref, o_ref, *,
                            K, S, L, C_out_p):
    # x_ref:    (C_in, S*L)        bf16
    # w_ref:    (K, C_out_p, C_in) bf16
    # ab_ref:   (L, K*L)           bf16  K graph blocks stacked along lanes
    # bias_ref: (C_out_p, L)       f32
    # o_ref:    (C_out_p, S*L)     f32
    ab = ab_ref[...]
    bias = bias_ref[...]
    for s in range(S):
        # One MXU push for all K graph contractions of this 128-lane slice.
        z = jnp.dot(x_ref[:, s * L:(s + 1) * L], ab,
                    preferred_element_type=jnp.float32)         # (C_in, K*L)
        acc = bias
        for k in range(K):
            zk = z[:, k * L:(k + 1) * L].astype(jnp.bfloat16)
            acc = acc + jnp.dot(w_ref[k], zk,
                                preferred_element_type=jnp.float32)
        o_ref[:, s * L:(s + 1) * L] = acc


def _plan_tiles(T, V, max_lanes=512):
    """Lane-friendly padding + tile plan.

    Returns (Vp, L, f, S, grid_j, T_pad):
      Vp:     node count zero-padded to a divisor of 128 (or multiple of 128),
      L:      graph-block lane width (128, or Vp if V > 128),
      f:      frames per graph block (L // Vp),
      S:      graph blocks per pipeline tile (tile width = S*L lanes),
      grid_j: number of tiles along time,
      T_pad:  zero-padded temporal length (= grid_j * S * f).
    """
    if V <= 128:
        Vp = next(vp for vp in (1, 2, 4, 8, 16, 32, 64, 128) if vp >= V)
        L = _LANE_BLOCK
    else:
        Vp = -(-V // 128) * 128
        L = Vp
    f = L // Vp
    S = max(1, min(max_lanes // L, -(-T // f)))
    grid_j = -(-T // (S * f))
    T_pad = grid_j * S * f
    return Vp, L, f, S, grid_j, T_pad


@jax.jit
def conv_temporal_graphical(x, A, W, b):
    """x: (N, C_in, T, V) f32;  A: (K, V, V) f32;
       W: (K*C_out, C_in) f32 (1x1 conv weight, squeezed);  b: (K*C_out,) f32.
       Returns (out: (N, C_out, T, V) f32, A)."""
    N, C_in, T, V = x.shape
    K = A.shape[0]
    C_out = W.shape[0] // K
    C_out_p = -(-C_out // 8) * 8                  # sublane-pad output channels

    Vp, L, f, S, grid_j, T_pad = _plan_tiles(T, V)
    TVB = S * L                                   # lanes per pipeline tile

    # --- input: zero-pad (T, V) to lane-friendly sizes, cast bf16, flatten.
    if (T_pad, Vp) != (T, V):
        x = jnp.pad(x, ((0, 0), (0, 0), (0, T_pad - T), (0, Vp - V)))
    x_flat = x.astype(jnp.bfloat16).reshape(N, C_in, T_pad * Vp)

    # --- tiny weight-side precompute (runs once on params, fused by XLA).
    A_pad = jnp.pad(A, ((0, 0), (0, Vp - V), (0, Vp - V)))
    Wk = W.reshape(K, C_out, C_in)
    Wk = jnp.pad(Wk, ((0, 0), (0, C_out_p - C_out), (0, 0)))   # (K, C_out_p, C_in)
    bk = jnp.pad(b.reshape(K, C_out), ((0, 0), (0, C_out_p - C_out)))
    # Bias folded through A: bias[c, w] = sum_k b[k, c] * sum_v A[k, v, w]
    bias_cw = jnp.einsum('kc,kw->cw', bk, A_pad.sum(axis=1))    # (C_out_p, Vp)
    bias_tile = jnp.tile(bias_cw, (1, f)).astype(jnp.float32)   # (C_out_p, L)
    # Fixed-width graph blocks AB_k = kron(I_f, A_k) acting on one 128-lane slice.
    eye = jnp.eye(f, dtype=A.dtype)
    AB = jnp.einsum('ij,kvw->kivjw', eye, A_pad).reshape(K, L, L)

    graph_first = bool(C_in < C_out)
    if graph_first:                               # fewer FLOPs when C_in < C_out
        w_arg = Wk.astype(jnp.bfloat16)                                    # (K,C_out_p,C_in)
        ab_arg = AB.transpose(1, 0, 2).reshape(L, K * L).astype(jnp.bfloat16)  # (L, K*L)
        w_spec = pl.BlockSpec((K, C_out_p, C_in), lambda n, j: (0, 0, 0))
        ab_spec = pl.BlockSpec((L, K * L), lambda n, j: (0, 0))
        kernel = functools.partial(_gcn_kernel_graph_first,
                                   K=K, S=S, L=L, C_out_p=C_out_p)
    else:
        w_arg = Wk.reshape(K * C_out_p, C_in).astype(jnp.bfloat16)         # (K*C_out_p, C_in)
        ab_arg = AB.astype(jnp.bfloat16)                                   # (K, L, L)
        w_spec = pl.BlockSpec((K * C_out_p, C_in), lambda n, j: (0, 0))
        ab_spec = pl.BlockSpec((K, L, L), lambda n, j: (0, 0, 0))
        kernel = functools.partial(_gcn_kernel_conv_first,
                                   K=K, S=S, L=L, C_out_p=C_out_p)

    # VMEM: double-buffered x/out tiles + small resident constants (v7x-safe).
    vmem_need = (2 * C_in * TVB * 2 + 2 * C_out_p * TVB * 4
                 + 2 * w_arg.size * 2 + 2 * ab_arg.size * 2
                 + 2 * bias_tile.size * 4)
    vmem_limit = int(min(max(4 * vmem_need, 16 * 1024 * 1024),
                         48 * 1024 * 1024))

    out_flat = pl.pallas_call(
        kernel,
        out_shape=jax.ShapeDtypeStruct((N, C_out_p, T_pad * Vp), jnp.float32),
        grid_spec=pltpu.PrefetchScalarGridSpec(
            num_scalar_prefetch=0,
            grid=(N, grid_j),
            in_specs=[
                pl.BlockSpec((None, C_in, TVB), lambda n, j: (n, 0, j)),
                w_spec,
                ab_spec,
                pl.BlockSpec((C_out_p, L), lambda n, j: (0, 0)),
            ],
            out_specs=pl.BlockSpec((None, C_out_p, TVB), lambda n, j: (n, 0, j)),
        ),
        compiler_params=pltpu.CompilerParams(
            dimension_semantics=("parallel", "parallel"),
            vmem_limit_bytes=vmem_limit),
    )(x_flat, w_arg, ab_arg, bias_tile)

    out = out_flat.reshape(N, C_out_p, T_pad, Vp)[:, :C_out, :T, :V]
    return out, A


def _reference(x, A, W, b):
    K = A.shape[0]
    C_out = W.shape[0] // K
    Wk = W.reshape(K, C_out, -1)
    bk = b.reshape(K, C_out)
    # pointwise conv: y[n,k,c,t,v] = sum_ci Wk[k,c,ci]*x[n,ci,t,v] + bk[k,c]
    y = jnp.einsum('kci,nitv->nkctv', Wk, x) + bk[None, :, :, None, None]
    return jnp.einsum('nkctv,kvw->nctw', y, A)


def _run_case(key, N, C_in, C_out, K, T, V):
    kx, ka, kw, kb = jax.random.split(key, 4)
    x = jax.random.normal(kx, (N, C_in, T, V), dtype=jnp.float32)
    A = jax.random.normal(ka, (K, V, V), dtype=jnp.float32)
    W = jax.random.normal(kw, (K * C_out, C_in), dtype=jnp.float32) * 0.1
    b = jax.random.normal(kb, (K * C_out,), dtype=jnp.float32) * 0.1

    out, A_out = conv_temporal_graphical(x, A, W, b)
    out = jax.block_until_ready(out)

    ref = _reference(x, A, W, b)
    assert out.shape == (N, C_out, T, V), out.shape
    assert A_out.shape == A.shape
    err = float(jnp.max(jnp.abs(out - ref)))
    # bf16 matmul operands with f32 accumulation: loosened tolerance.
    assert jnp.allclose(out, ref, atol=5e-2, rtol=5e-2), err
    return err


if __name__ == "__main__":
    key = jax.random.PRNGKey(0)
    k1, k2, k3 = jax.random.split(key, 3)
    # Case 1: C_in < C_out (graph-first path), no padding needed.
    _run_case(k1, N=2, C_in=4, C_out=8, K=3, T=64, V=16)
    # Case 2: C_in >= C_out (conv-first path), no padding needed.
    _run_case(k2, N=2, C_in=8, C_out=4, K=2, T=32, V=16)
    # Case 3: ragged V/T/C_out exercise the zero-padding path (V=12 -> 16,
    # T=20 -> 24, C_out=5 -> 8), like real ST-GCN graphs with V=25/18.
    _run_case(k3, N=1, C_in=3, C_out=5, K=2, T=20, V=12)
    print("KERNEL_OK")
</pallas_src>

<mosaic_0001>
module attributes {stable_mosaic.version = 11 : i64} {
  func.func @_gcn_kernel_graph_first(%arg0: i32, %arg1: i32, %arg2: memref<1x4x512xbf16, #tpu.memory_space<vmem>>, %arg3: memref<3x8x4xbf16, #tpu.memory_space<vmem>>, %arg4: memref<128x384xbf16, #tpu.memory_space<vmem>>, %arg5: memref<8x128xf32, #tpu.memory_space<vmem>>, %arg6: memref<1x8x512xf32, #tpu.memory_space<vmem>>) attributes {dimension_semantics = [#tpu.dimension_semantics<parallel>, #tpu.dimension_semantics<parallel>], iteration_bounds = array<i64: 2, 2>, scalar_prefetch = 0 : i64, scratch_operands = 0 : i64, tpu.core_type = #tpu.core_type<tc>, window_params = [{transform_indices = @transform_0, window_bounds = array<i64: 1, 4, 512>}, {pipeline_mode = #tpu.pipeline_mode<synchronous>, transform_indices = @transform_1, window_bounds = array<i64: 3, 8, 4>}, {pipeline_mode = #tpu.pipeline_mode<synchronous>, transform_indices = @transform_2, window_bounds = array<i64: 128, 384>}, {pipeline_mode = #tpu.pipeline_mode<synchronous>, transform_indices = @transform_3, window_bounds = array<i64: 8, 128>}, {transform_indices = @transform_4, window_bounds = array<i64: 1, 8, 512>}]} {
    %c0 = arith.constant 0 : index
    %c0_0 = arith.constant 0 : index
    %0 = vector.load %arg4[%c0, %c0_0] : memref<128x384xbf16, #tpu.memory_space<vmem>>, vector<128x384xbf16>
    %c0_1 = arith.constant 0 : index
    %c0_2 = arith.constant 0 : index
    %1 = vector.load %arg5[%c0_1, %c0_2] : memref<8x128xf32, #tpu.memory_space<vmem>>, vector<8x128xf32>
    %c0_3 = arith.constant 0 : index
    %c0_4 = arith.constant 0 : index
    %c0_5 = arith.constant 0 : index
    %2 = vector.load %arg2[%c0_3, %c0_4, %c0_5] : memref<1x4x512xbf16, #tpu.memory_space<vmem>>, vector<1x4x128xbf16>
    %3 = vector.shape_cast %2 : vector<1x4x128xbf16> to vector<4x128xbf16>
    %cst = arith.constant dense<0.000000e+00> : vector<4x384xf32>
    %4 = tpu.matmul %3, %0, %cst {dimension_numbers = #tpu.dot_dimension_numbers<[1], [0], [0], [1], [0, 0, 1, 1], [], []>} : vector<4x128xbf16>, vector<128x384xbf16>, vector<4x384xf32> -> vector<4x384xf32>
    %5 = vector.extract_strided_slice %4 {offsets = [0, 0], sizes = [4, 128], strides = [1, 1]} : vector<4x384xf32> to vector<4x128xf32>
    %6 = arith.truncf %5 : vector<4x128xf32> to vector<4x128xbf16>
    %c0_6 = arith.constant 0 : index
    %c0_7 = arith.constant 0 : index
    %c0_8 = arith.constant 0 : index
    %7 = vector.load %arg3[%c0_6, %c0_7, %c0_8] : memref<3x8x4xbf16, #tpu.memory_space<vmem>>, vector<1x8x4xbf16>
    %8 = vector.shape_cast %7 : vector<1x8x4xbf16> to vector<8x4xbf16>
    %cst_9 = arith.constant dense<0.000000e+00> : vector<8x128xf32>
    %9 = tpu.matmul %8, %6, %cst_9 {dimension_numbers = #tpu.dot_dimension_numbers<[1], [0], [0], [1], [0, 0, 1, 1], [], []>} : vector<8x4xbf16>, vector<4x128xbf16>, vector<8x128xf32> -> vector<8x128xf32>
    %10 = arith.addf %1, %9 : vector<8x128xf32>
    %11 = vector.extract_strided_slice %4 {offsets = [0, 128], sizes = [4, 128], strides = [1, 1]} : vector<4x384xf32> to vector<4x128xf32>
    %12 = arith.truncf %11 : vector<4x128xf32> to vector<4x128xbf16>
    %c1 = arith.constant 1 : index
    %c0_10 = arith.constant 0 : index
    %c0_11 = arith.constant 0 : index
    %13 = vector.load %arg3[%c1, %c0_10, %c0_11] : memref<3x8x4xbf16, #tpu.memory_space<vmem>>, vector<1x8x4xbf16>
    %14 = vector.shape_cast %13 : vector<1x8x4xbf16> to vector<8x4xbf16>
    %cst_12 = arith.constant dense<0.000000e+00> : vector<8x128xf32>
    %15 = tpu.matmul %14, %12, %cst_12 {dimension_numbers = #tpu.dot_dimension_numbers<[1], [0], [0], [1], [0, 0, 1, 1], [], []>} : vector<8x4xbf16>, vector<4x128xbf16>, vector<8x128xf32> -> vector<8x128xf32>
    %16 = arith.addf %10, %15 : vector<8x128xf32>
    %17 = vector.extract_strided_slice %4 {offsets = [0, 256], sizes = [4, 128], strides = [1, 1]} : vector<4x384xf32> to vector<4x128xf32>
    %18 = arith.truncf %17 : vector<4x128xf32> to vector<4x128xbf16>
    %c2 = arith.constant 2 : index
    %c0_13 = arith.constant 0 : index
    %c0_14 = arith.constant 0 : index
    %19 = vector.load %arg3[%c2, %c0_13, %c0_14] : memref<3x8x4xbf16, #tpu.memory_space<vmem>>, vector<1x8x4xbf16>
    %20 = vector.shape_cast %19 : vector<1x8x4xbf16> to vector<8x4xbf16>
    %cst_15 = arith.constant dense<0.000000e+00> : vector<8x128xf32>
    %21 = tpu.matmul %20, %18, %cst_15 {dimension_numbers = #tpu.dot_dimension_numbers<[1], [0], [0], [1], [0, 0, 1, 1], [], []>} : vector<8x4xbf16>, vector<4x128xbf16>, vector<8x128xf32> -> vector<8x128xf32>
    %22 = arith.addf %16, %21 : vector<8x128xf32>
    %c0_16 = arith.constant 0 : index
    %c0_17 = arith.constant 0 : index
    %c0_18 = arith.constant 0 : index
    %23 = vector.load %arg6[%c0_16, %c0_17, %c0_18] : memref<1x8x512xf32, #tpu.memory_space<vmem>>, vector<1x8x128xf32>
    %24 = vector.shape_cast %23 : vector<1x8x128xf32> to vector<8x128xf32>
    %25 = vector.shape_cast %22 : vector<8x128xf32> to vector<1x8x128xf32>
    tpu.vector_store %arg6[%c0_16, %c0_17, %c0_18], %25 {strides = array<i32>} : memref<1x8x512xf32, #tpu.memory_space<vmem>>, vector<1x8x128xf32>,
    %c0_19 = arith.constant 0 : index
    %c0_20 = arith.constant 0 : index
    %c128 = arith.constant 128 : index
    %26 = vector.load %arg2[%c0_19, %c0_20, %c128] : memref<1x4x512xbf16, #tpu.memory_space<vmem>>, vector<1x4x128xbf16>
    %27 = vector.shape_cast %26 : vector<1x4x128xbf16> to vector<4x128xbf16>
    %cst_21 = arith.constant dense<0.000000e+00> : vector<4x384xf32>
    %28 = tpu.matmul %27, %0, %cst_21 {dimension_numbers = #tpu.dot_dimension_numbers<[1], [0], [0], [1], [0, 0, 1, 1], [], []>} : vector<4x128xbf16>, vector<128x384xbf16>, vector<4x384xf32> -> vector<4x384xf32>
    %29 = vector.extract_strided_slice %28 {offsets = [0, 0], sizes = [4, 128], strides = [1, 1]} : vector<4x384xf32> to vector<4x128xf32>
    %30 = arith.truncf %29 : vector<4x128xf32> to vector<4x128xbf16>
    %c0_22 = arith.constant 0 : index
    %c0_23 = arith.constant 0 : index
    %c0_24 = arith.constant 0 : index
    %31 = vector.load %arg3[%c0_22, %c0_23, %c0_24] : memref<3x8x4xbf16, #tpu.memory_space<vmem>>, vector<1x8x4xbf16>
    %32 = vector.shape_cast %31 : vector<1x8x4xbf16> to vector<8x4xbf16>
    %cst_25 = arith.constant dense<0.000000e+00> : vector<8x128xf32>
    %33 = tpu.matmul %32, %30, %cst_25 {dimension_numbers = #tpu.dot_dimension_numbers<[1], [0], [0], [1], [0, 0, 1, 1], [], []>} : vector<8x4xbf16>, vector<4x128xbf16>, vector<8x128xf32> -> vector<8x128xf32>
    %34 = arith.addf %1, %33 : vector<8x128xf32>
    %35 = vector.extract_strided_slice %28 {offsets = [0, 128], sizes = [4, 128], strides = [1, 1]} : vector<4x384xf32> to vector<4x128xf32>
    %36 = arith.truncf %35 : vector<4x128xf32> to vector<4x128xbf16>
    %c1_26 = arith.constant 1 : index
    %c0_27 = arith.constant 0 : index
    %c0_28 = arith.constant 0 : index
    %37 = vector.load %arg3[%c1_26, %c0_27, %c0_28] : memref<3x8x4xbf16, #tpu.memory_space<vmem>>, vector<1x8x4xbf16>
    %38 = vector.shape_cast %37 : vector<1x8x4xbf16> to vector<8x4xbf16>
    %cst_29 = arith.constant dense<0.000000e+00> : vector<8x128xf32>
    %39 = tpu.matmul %38, %36, %cst_29 {dimension_numbers = #tpu.dot_dimension_numbers<[1], [0], [0], [1], [0, 0, 1, 1], [], []>} : vector<8x4xbf16>, vector<4x128xbf16>, vector<8x128xf32> -> vector<8x128xf32>
    %40 = arith.addf %34, %39 : vector<8x128xf32>
    %41 = vector.extract_strided_slice %28 {offsets = [0, 256], sizes = [4, 128], strides = [1, 1]} : vector<4x384xf32> to vector<4x128xf32>
    %42 = arith.truncf %41 : vector<4x128xf32> to vector<4x128xbf16>
    %c2_30 = arith.constant 2 : index
    %c0_31 = arith.constant 0 : index
    %c0_32 = arith.constant 0 : index
    %43 = vector.load %arg3[%c2_30, %c0_31, %c0_32] : memref<3x8x4xbf16, #tpu.memory_space<vmem>>, vector<1x8x4xbf16>
    %44 = vector.shape_cast %43 : vector<1x8x4xbf16> to vector<8x4xbf16>
    %cst_33 = arith.constant dense<0.000000e+00> : vector<8x128xf32>
    %45 = tpu.matmul %44, %42, %cst_33 {dimension_numbers = #tpu.dot_dimension_numbers<[1], [0], [0], [1], [0, 0, 1, 1], [], []>} : vector<8x4xbf16>, vector<4x128xbf16>, vector<8x128xf32> -> vector<8x128xf32>
    %46 = arith.addf %40, %45 : vector<8x128xf32>
    %c0_34 = arith.constant 0 : index
    %c0_35 = arith.constant 0 : index
    %c128_36 = arith.constant 128 : index
    %47 = vector.load %arg6[%c0_34, %c0_35, %c128_36] : memref<1x8x512xf32, #tpu.memory_space<vmem>>, vector<1x8x128xf32>
    %48 = vector.shape_cast %47 : vector<1x8x128xf32> to vector<8x128xf32>
    %49 = vector.shape_cast %46 : vector<8x128xf32> to vector<1x8x128xf32>
    tpu.vector_store %arg6[%c0_34, %c0_35, %c128_36], %49 {strides = array<i32>} : memref<1x8x512xf32, #tpu.memory_space<vmem>>, vector<1x8x128xf32>,
    %c0_37 = arith.constant 0 : index
    %c0_38 = arith.constant 0 : index
    %c256 = arith.constant 256 : index
    %50 = vector.load %arg2[%c0_37, %c0_38, %c256] : memref<1x4x512xbf16, #tpu.memory_space<vmem>>, vector<1x4x128xbf16>
    %51 = vector.shape_cast %50 : vector<1x4x128xbf16> to vector<4x128xbf16>
    %cst_39 = arith.constant dense<0.000000e+00> : vector<4x384xf32>
    %52 = tpu.matmul %51, %0, %cst_39 {dimension_numbers = #tpu.dot_dimension_numbers<[1], [0], [0], [1], [0, 0, 1, 1], [], []>} : vector<4x128xbf16>, vector<128x384xbf16>, vector<4x384xf32> -> vector<4x384xf32>
    %53 = vector.extract_strided_slice %52 {offsets = [0, 0], sizes = [4, 128], strides = [1, 1]} : vector<4x384xf32> to vector<4x128xf32>
    %54 = arith.truncf %53 : vector<4x128xf32> to vector<4x128xbf16>
    %c0_40 = arith.constant 0 : index
    %c0_41 = arith.constant 0 : index
    %c0_42 = arith.constant 0 : index
    %55 = vector.load %arg3[%c0_40, %c0_41, %c0_42] : memref<3x8x4xbf16, #tpu.memory_space<vmem>>, vector<1x8x4xbf16>
    %56 = vector.shape_cast %55 : vector<1x8x4xbf16> to vector<8x4xbf16>
    %cst_43 = arith.constant dense<0.000000e+00> : vector<8x128xf32>
    %57 = tpu.matmul %56, %54, %cst_43 {dimension_numbers = #tpu.dot_dimension_numbers<[1], [0], [0], [1], [0, 0, 1, 1], [], []>} : vector<8x4xbf16>, vector<4x128xbf16>, vector<8x128xf32> -> vector<8x128xf32>
    %58 = arith.addf %1, %57 : vector<8x128xf32>
    %59 = vector.extract_strided_slice %52 {offsets = [0, 128], sizes = [4, 128], strides = [1, 1]} : vector<4x384xf32> to vector<4x128xf32>
    %60 = arith.truncf %59 : vector<4x128xf32> to vector<4x128xbf16>
    %c1_44 = arith.constant 1 : index
    %c0_45 = arith.constant 0 : index
    %c0_46 = arith.constant 0 : index
    %61 = vector.load %arg3[%c1_44, %c0_45, %c0_46] : memref<3x8x4xbf16, #tpu.memory_space<vmem>>, vector<1x8x4xbf16>
    %62 = vector.shape_cast %61 : vector<1x8x4xbf16> to vector<8x4xbf16>
    %cst_47 = arith.constant dense<0.000000e+00> : vector<8x128xf32>
    %63 = tpu.matmul %62, %60, %cst_47 {dimension_numbers = #tpu.dot_dimension_numbers<[1], [0], [0], [1], [0, 0, 1, 1], [], []>} : vector<8x4xbf16>, vector<4x128xbf16>, vector<8x128xf32> -> vector<8x128xf32>
    %64 = arith.addf %58, %63 : vector<8x128xf32>
    %65 = vector.extract_strided_slice %52 {offsets = [0, 256], sizes = [4, 128], strides = [1, 1]} : vector<4x384xf32> to vector<4x128xf32>
    %66 = arith.truncf %65 : vector<4x128xf32> to vector<4x128xbf16>
    %c2_48 = arith.constant 2 : index
    %c0_49 = arith.constant 0 : index
    %c0_50 = arith.constant 0 : index
    %67 = vector.load %arg3[%c2_48, %c0_49, %c0_50] : memref<3x8x4xbf16, #tpu.memory_space<vmem>>, vector<1x8x4xbf16>
    %68 = vector.shape_cast %67 : vector<1x8x4xbf16> to vector<8x4xbf16>
    %cst_51 = arith.constant dense<0.000000e+00> : vector<8x128xf32>
    %69 = tpu.matmul %68, %66, %cst_51 {dimension_numbers = #tpu.dot_dimension_numbers<[1], [0], [0], [1], [0, 0, 1, 1], [], []>} : vector<8x4xbf16>, vector<4x128xbf16>, vector<8x128xf32> -> vector<8x128xf32>
    %70 = arith.addf %64, %69 : vector<8x128xf32>
    %c0_52 = arith.constant 0 : index
    %c0_53 = arith.constant 0 : index
    %c256_54 = arith.constant 256 : index
    %71 = vector.load %arg6[%c0_52, %c0_53, %c256_54] : memref<1x8x512xf32, #tpu.memory_space<vmem>>, vector<1x8x128xf32>
    %72 = vector.shape_cast %71 : vector<1x8x128xf32> to vector<8x128xf32>
    %73 = vector.shape_cast %70 : vector<8x128xf32> to vector<1x8x128xf32>
    tpu.vector_store %arg6[%c0_52, %c0_53, %c256_54], %73 {strides = array<i32>} : memref<1x8x512xf32, #tpu.memory_space<vmem>>, vector<1x8x128xf32>,
    %c0_55 = arith.constant 0 : index
    %c0_56 = arith.constant 0 : index
    %c384 = arith.constant 384 : index
    %74 = vector.load %arg2[%c0_55, %c0_56, %c384] : memref<1x4x512xbf16, #tpu.memory_space<vmem>>, vector<1x4x128xbf16>
    %75 = vector.shape_cast %74 : vector<1x4x128xbf16> to vector<4x128xbf16>
    %cst_57 = arith.constant dense<0.000000e+00> : vector<4x384xf32>
    %76 = tpu.matmul %75, %0, %cst_57 {dimension_numbers = #tpu.dot_dimension_numbers<[1], [0], [0], [1], [0, 0, 1, 1], [], []>} : vector<4x128xbf16>, vector<128x384xbf16>, vector<4x384xf32> -> vector<4x384xf32>
    %77 = vector.extract_strided_slice %76 {offsets = [0, 0], sizes = [4, 128], strides = [1, 1]} : vector<4x384xf32> to vector<4x128xf32>
    %78 = arith.truncf %77 : vector<4x128xf32> to vector<4x128xbf16>
    %c0_58 = arith.constant 0 : index
    %c0_59 = arith.constant 0 : index
    %c0_60 = arith.constant 0 : index
    %79 = vector.load %arg3[%c0_58, %c0_59, %c0_60] : memref<3x8x4xbf16, #tpu.memory_space<vmem>>, vector<1x8x4xbf16>
    %80 = vector.shape_cast %79 : vector<1x8x4xbf16> to vector<8x4xbf16>
    %cst_61 = arith.constant dense<0.000000e+00> : vector<8x128xf32>
    %81 = tpu.matmul %80, %78, %cst_61 {dimension_numbers = #tpu.dot_dimension_numbers<[1], [0], [0], [1], [0, 0, 1, 1], [], []>} : vector<8x4xbf16>, vector<4x128xbf16>, vector<8x128xf32> -> vector<8x128xf32>
    %82 = arith.addf %1, %81 : vector<8x128xf32>
    %83 = vector.extract_strided_slice %76 {offsets = [0, 128], sizes = [4, 128], strides = [1, 1]} : vector<4x384xf32> to vector<4x128xf32>
    %84 = arith.truncf %83 : vector<4x128xf32> to vector<4x128xbf16>
    %c1_62 = arith.constant 1 : index
    %c0_63 = arith.constant 0 : index
    %c0_64 = arith.constant 0 : index
    %85 = vector.load %arg3[%c1_62, %c0_63, %c0_64] : memref<3x8x4xbf16, #tpu.memory_space<vmem>>, vector<1x8x4xbf16>
    %86 = vector.shape_cast %85 : vector<1x8x4xbf16> to vector<8x4xbf16>
    %cst_65 = arith.constant dense<0.000000e+00> : vector<8x128xf32>
    %87 = tpu.matmul %86, %84, %cst_65 {dimension_numbers = #tpu.dot_dimension_numbers<[1], [0], [0], [1], [0, 0, 1, 1], [], []>} : vector<8x4xbf16>, vector<4x128xbf16>, vector<8x128xf32> -> vector<8x128xf32>
    %88 = arith.addf %82, %87 : vector<8x128xf32>
    %89 = vector.extract_strided_slice %76 {offsets = [0, 256], sizes = [4, 128], strides = [1, 1]} : vector<4x384xf32> to vector<4x128xf32>
    %90 = arith.truncf %89 : vector<4x128xf32> to vector<4x128xbf16>
    %c2_66 = arith.constant 2 : index
    %c0_67 = arith.constant 0 : index
    %c0_68 = arith.constant 0 : index
    %91 = vector.load %arg3[%c2_66, %c0_67, %c0_68] : memref<3x8x4xbf16, #tpu.memory_space<vmem>>, vector<1x8x4xbf16>
    %92 = vector.shape_cast %91 : vector<1x8x4xbf16> to vector<8x4xbf16>
    %cst_69 = arith.constant dense<0.000000e+00> : vector<8x128xf32>
    %93 = tpu.matmul %92, %90, %cst_69 {dimension_numbers = #tpu.dot_dimension_numbers<[1], [0], [0], [1], [0, 0, 1, 1], [], []>} : vector<8x4xbf16>, vector<4x128xbf16>, vector<8x128xf32> -> vector<8x128xf32>
    %94 = arith.addf %88, %93 : vector<8x128xf32>
    %c0_70 = arith.constant 0 : index
    %c0_71 = arith.constant 0 : index
    %c384_72 = arith.constant 384 : index
    %95 = vector.load %arg6[%c0_70, %c0_71, %c384_72] : memref<1x8x512xf32, #tpu.memory_space<vmem>>, vector<1x8x128xf32>
    %96 = vector.shape_cast %95 : vector<1x8x128xf32> to vector<8x128xf32>
    %97 = vector.shape_cast %94 : vector<8x128xf32> to vector<1x8x128xf32>
    tpu.vector_store %arg6[%c0_70, %c0_71, %c384_72], %97 {strides = array<i32>} : memref<1x8x512xf32, #tpu.memory_space<vmem>>, vector<1x8x128xf32>,
    return
  }
  func.func @transform_0(%arg0: i32, %arg1: i32) -> (i32, i32, i32) {
    %c0_i32 = arith.constant 0 : i32
    %c0_i32_0 = arith.constant 0 : i32
    return %arg0, %c0_i32, %arg1 : i32, i32, i32
  }
  func.func @transform_1(%arg0: i32, %arg1: i32) -> (i32, i32, i32) {
    %c0_i32 = arith.constant 0 : i32
    %c0_i32_0 = arith.constant 0 : i32
    %c0_i32_1 = arith.constant 0 : i32
    %c0_i32_2 = arith.constant 0 : i32
    return %c0_i32, %c0_i32_0, %c0_i32_1 : i32, i32, i32
  }
  func.func @transform_2(%arg0: i32, %arg1: i32) -> (i32, i32) {
    %c0_i32 = arith.constant 0 : i32
    %c0_i32_0 = arith.constant 0 : i32
    %c0_i32_1 = arith.constant 0 : i32
    return %c0_i32, %c0_i32_0 : i32, i32
  }
  func.func @transform_3(%arg0: i32, %arg1: i32) -> (i32, i32) {
    %c0_i32 = arith.constant 0 : i32
    %c0_i32_0 = arith.constant 0 : i32
    %c0_i32_1 = arith.constant 0 : i32
    return %c0_i32, %c0_i32_0 : i32, i32
  }
  func.func @transform_4(%arg0: i32, %arg1: i32) -> (i32, i32, i32) {
    %c0_i32 = arith.constant 0 : i32
    %c0_i32_0 = arith.constant 0 : i32
    return %arg0, %c0_i32, %arg1 : i32, i32, i32
  }
}

</mosaic_0001>

<bundles_post_ra>
// kernel: tile.9
= control target key start
LH: loop header
LB: loop body
LE: loop exit
PB: predicated region body
PF: predicated region fallthrough
CT: control target
= control target key end

     0   :  { %vm4_vm0 = vcmask 1047556   ;;  %s99_s14 = smov 112   ;;  %s100_s15 = smov 80   ;;  %vm6_vm1 = vcmask 130048   ;;  %vm16_vm2 = vcmask 1048448   ;;  %vm26_vm3 = vcmask 917248   ;;  %s196_s0 = inlined_call_operand.vmem [shape: f32[8,8,16], index: 0, kind: input, shape index: {}]   ;;  %s197_s1 = inlined_call_operand.vmem [shape: f32[8,128], index: 1, kind: output, shape index: {}]  }
   0x1   :  { %v78_v0 = vld [vmem:[%s196_s0 + $0x7] ss:$8 sm:$0xf]   ;;  %v82_v3 = vld [vmem:[%s196_s0 + $0x5] ss:$8 sm:$0xf]  }
   0x2   :  { %v79_v1 = vld [vmem:[%s196_s0 + $0x7] ss:$8 sm:$0xf0]   ;;  %v83_v4 = vld [vmem:[%s196_s0 + $0x5] ss:$8 sm:$0xf0]  }
   0x3   :  { %v13_v2 = vsel %vm4_vm0, %v79_v1, %v78_v0  ;;  %v33_v5 = vsel %vm4_vm0, %v83_v4, %v82_v3  ;;  %v80_v6 = vld [vmem:[%s196_s0 + $0x6] ss:$8 sm:$0xf]   ;;  %v84_v8 = vld [vmem:[%s196_s0 + $0x4] ss:$8 sm:$0xf]  }
   0x4   :  { %14 = vrot.lane.b32.xlu0 %v13_v2, %s99_s14  ;;  %34 = vrot.lane.b32.xlu1 %v33_v5, %s100_s15  ;;  %v81_v7 = vld [vmem:[%s196_s0 + $0x6] ss:$8 sm:$0xf0]   ;;  %v85_v9 = vld [vmem:[%s196_s0 + $0x4] ss:$8 sm:$0xf0]  }
   0x5   :  { %v86_v10 = vld [vmem:[%s196_s0 + $0x3] ss:$8 sm:$0xf]   ;;  %v23_v12 = vsel %vm4_vm0, %v81_v7, %v80_v6  ;;  %v43_v14 = vsel %vm4_vm0, %v85_v9, %v84_v8  ;;  %s101_s28 = smov 48   ;;  %s102_s29 = smov 96   ;;  %vm36_vm4 = vcmask 786048  }
   0x6   :  { %v87_v11 = vld [vmem:[%s196_s0 + $0x3] ss:$8 sm:$0xf0]   ;;  %v88_v15 = vld [vmem:[%s196_s0 + $0x2] ss:$8 sm:$0xf]  }
   0x7   :  { %v53_v13 = vsel %vm4_vm0, %v87_v11, %v86_v10  ;;  %v89_v16 = vld [vmem:[%s196_s0 + $0x2] ss:$8 sm:$0xf0]   ;;  %s103_s5 = smov 64   ;;  %s104_s10 = smov 32   ;;  %vm46_vm5 = vcmask 654848  }
   0x8   :  { %54 = vrot.lane.b32.xlu2 %v53_v13, %s101_s28  ;;  %v90_v17 = vld [vmem:[%s196_s0 + $0x1] ss:$8 sm:$0xf]   ;;  %v63_v19 = vsel %vm4_vm0, %v89_v16, %v88_v15  ;;  %s105_s11 = smov 16   ;;  %vm56_vm6 = vcmask 523648   ;;  %vm66_vm7 = vcmask 392448  }
   0x9   :  { %v91_v18 = vld [vmem:[%s196_s0 + $0x1] ss:$8 sm:$0xf0]   ;;  %v2_v21 = vld [vmem:[%s196_s0] ss:$8 sm:$0xf]  }
   0xa   :  { %v73_v20 = vsel %vm4_vm0, %v91_v18, %v90_v17  ;;  %v3_v22 = vld [vmem:[%s196_s0] ss:$8 sm:$0xf0]   ;;  %vm76_vm8 = vcmask 261248  }
   0xb   :  { %v5_v23 = vsel %vm4_vm0, %v3_v22, %v2_v21 }
   0xc   :  { %24 = vrot.lane.b32.xlu0 %v23_v12, %s102_s29  ;;  %44 = vrot.lane.b32.xlu1 %v43_v14, %s103_s5  ;;  %7 = vst.msk [vmem:[%s197_s1] sm:$0xff] %vm6_vm1, %v5_v23  }
  0x10   :  { %64 = vrot.lane.b32.xlu2 %v63_v19, %s104_s10 }
  0x14   :  { %74 = vrot.lane.b32.xlu0 %v73_v20, %s105_s11 }
  0x62   :  { %v55_v24 = vpop.permute.xlu2 %54  }
  0x6a   :  { %v65_v25 = vpop.permute.xlu2 %64  }
  0x76   :  { %v15_v26 = vpop.permute.xlu0 %14   ;;  %v35_v27 = vpop.permute.xlu1 %34  }
  0x77   :  { %17 = vst.msk [vmem:[%s197_s1] sm:$0xff] %vm16_vm2, %v15_v26  }
  0x7e   :  { %v25_v28 = vpop.permute.xlu0 %24   ;;  %v45_v29 = vpop.permute.xlu1 %44  }
  0x7f   :  { %27 = vst.msk [vmem:[%s197_s1] sm:$0xff] %vm26_vm3, %v25_v28  }
  0x80   :  { %37 = vst.msk [vmem:[%s197_s1] sm:$0xff] %vm36_vm4, %v35_v27  }
  0x81   :  { %47 = vst.msk [vmem:[%s197_s1] sm:$0xff] %vm46_vm5, %v45_v29  }
  0x82   :  { %57 = vst.msk [vmem:[%s197_s1] sm:$0xff] %vm56_vm6, %v55_v24  }
  0x83   :  { %67 = vst.msk [vmem:[%s197_s1] sm:$0xff] %vm66_vm7, %v65_v25  }
  0x86   :  { %v75_v30 = vpop.permute.xlu0 %74  }
  0x87   :  { %77 = vst.msk [vmem:[%s197_s1] sm:$0xff] %vm76_vm8, %v75_v30  }

// kernel: conv_temporal_graphical.1
= control target key start
LH: loop header
LB: loop body
LE: loop exit
PB: predicated region body
PF: predicated region fallthrough
CT: control target
= control target key end

     0   :  { %s1179_s15 = smov 0   ;;  %s1181_s16 = smov 0   ;;  %s1615_s0 = inlined_call_operand.vmem [shape: bf16[2,4,1024], index: 0, kind: input, shape index: {}]   ;;  %s1616_s1 = inlined_call_operand.vmem [shape: bf16[3,8,4], index: 1, kind: input, shape index: {}]   ;;  %s1617_s2 = inlined_call_operand.vmem [shape: bf16[128,384], index: 2, kind: input, shape index: {}]   ;;  %s1618_s3 = inlined_call_operand.vmem [shape: f32[8,128], index: 3, kind: input, shape index: {}]   ;;  %s1619_s4 = inlined_call_operand.vmem [shape: f32[2,8,1024], index: 4, kind: output, shape index: {}]  }
   0x1   :  { %s1183_s17 = smov 0   ;;  %s1185_s18 = smov 0  }
   0x2   :  { %s1187_s19 = smov 0  }
   0x3 LB: > { %s23_s20 = sadd.s32 1, %s1144_s17  ;;  %s26_s21 = sadd.s32 1, %s1148_s18  ;;  %s1152_s19 = sphi %s1187_s19, %s14_s19   ;;  %s1148_s18 = sphi %s1185_s18, %s1624_s18   ;;  %s1144_s17 = sphi %s1183_s17, %s1623_s17   ;;  %s1140_s16 = sphi %s1181_s16, %s1622_s16   ;;  %s1136_s15 = sphi %s1179_s15, %s1621_s15  }
   0x4   : > { %p24_p0 = scmp.ge.s32.totalorder %s23_s20, 2  ;;  %p925_p1 = scmp.ge.s32.totalorder %s1152_s19, 1 }
   0x5   : > { %p183_p2 = scmp.lt.s32.totalorder %s1152_s19, 5 }
   0x6   : > { %s1626_s20 = smov (%p24_p0, %s23_s20), 0  ;;  %s1628_s21 = smov (!%p24_p0, %s26_s21), %s1148_s18 }
   0x7   : > { %p184_p3 = pnand %p925_p1, %p183_p2  ;;  %p28_p4 = scmp.ge.s32.totalorder %s1628_s21, 2 }
   0x8   : > { %s926_s10 = sshll.u32 (!%p184_p3), %s1136_s15, 2  ;;  %p218_p5 = scmp.lt.s32.totalorder (!%p184_p3), %s1140_s16, 1 }
   0x9   : > { %s1630_s21 = smov (%p28_p4, %s1628_s21), 0  ;;  %187 = sbr.rel (%p184_p3) target bundleno = 564 (0x234), region = 36 }
   0xa   : > { %p1332_p6 = scmp.lt.s32.totalorder (!%p184_p3), %s926_s10, 7 }
   0xe   : > { %v1018_v0 = vld [vmem:[%s1617_s2 + $0xa8] sm:$0xf]  ;;  %v1072_v1 = vld [vmem:[%s1617_s2 + $0xb0] sm:$0xf0]  ;;  %v1006_v2 = vld [vmem:[%s1617_s2 + $0x90] sm:$0xf] }
   0xf   : > { %v1222_v3 = vor.u32 %v1072_v1, %v1018_v0  ;;  %v1069_v4 = vld [vmem:[%s1617_s2 + $0x98] sm:$0xf0]  ;;  %v1071_v5 = vld [vmem:[%s1617_s2 + $0xac] sm:$0xf]  ;;  %v1020_v6 = vld [vmem:[%s1617_s2 + $0xb4] sm:$0xf0] }
  0x10   : > { %v1026_v7 = vld [vmem:[%s1617_s2 + $0xb0] sm:$0xf]  ;;  %v1237_v8 = vor.u32 %v1069_v4, %v1006_v2  ;;  %v994_v9 = vld [vmem:[%s1617_s2 + $0x78] sm:$0xf]  ;;  %v1066_v10 = vld [vmem:[%s1617_s2 + $0x80] sm:$0xf0]  ;;  %v1245_v11 = vor.u32 %v1071_v5, %v1020_v6 }
  0x11   : > { %400 = vmatpush.bf16.msra.mxu0 %v1222_v3  ;;  %v1073_v12 = vld [vmem:[%s1617_s2 + $0xb8] sm:$0xf0]  ;;  %v1068_v14 = vld [vmem:[%s1617_s2 + $0x94] sm:$0xf]  ;;  %v1008_v15 = vld [vmem:[%s1617_s2 + $0x9c] sm:$0xf0]  ;;  %v1277_v22 = vor.u32 %v1066_v10, %v994_v9 }
  0x12   : > { %v1250_v13 = vor.u32 %v1073_v12, %v1026_v7  ;;  %v1014_v16 = vld [vmem:[%s1617_s2 + $0x98] sm:$0xf]  ;;  %413 = vmatpush.bf16.msra.mxu1 %v1245_v11  ;;  %v1262_v17 = vor.u32 %v1068_v14, %v1008_v15  ;;  %v1070_v18 = vld [vmem:[%s1617_s2 + $0xa0] sm:$0xf0]  ;;  %v1065_v20 = vld [vmem:[%s1617_s2 + $0x7c] sm:$0xf] }
  0x13   : > { %v1268_v19 = vor.u32 %v1070_v18, %v1014_v16  ;;  %v996_v21 = vld [vmem:[%s1617_s2 + $0x84] sm:$0xf0]  ;;  %v1002_v23 = vld [vmem:[%s1617_s2 + $0x80] sm:$0xf]  ;;  %v1067_v24 = vld [vmem:[%s1617_s2 + $0x88] sm:$0xf0] }
  0x14   : > { %426 = vmatpush.bf16.msra.mxu2 %v1250_v13  ;;  %v982_v25 = vld [vmem:[%s1617_s2 + $0x60] sm:$0xf]  ;;  %v1063_v26 = vld [vmem:[%s1617_s2 + $0x68] sm:$0xf0]  ;;  %v1292_v27 = vor.u32 %v1065_v20, %v996_v21  ;;  %v1295_v28 = vor.u32 %v1067_v24, %v1002_v23  ;;  %v1062_v29 = vld [vmem:[%s1617_s2 + $0x64] sm:$0xf] }
  0x15   : > { %401 = vmatpush.bf16.msra.mxu0 %v1237_v8  ;;  %v984_v30 = vld [vmem:[%s1617_s2 + $0x6c] sm:$0xf0]  ;;  %v1304_v31 = vor.u32 %v1063_v26, %v982_v25  ;;  %v990_v32 = vld [vmem:[%s1617_s2 + $0x68] sm:$0xf]  ;;  %v1064_v33 = vld [vmem:[%s1617_s2 + $0x70] sm:$0xf0] }
  0x16   : > { %414 = vmatpush.bf16.msra.mxu1 %v1262_v17  ;;  %v970_v34 = vld [vmem:[%s1617_s2 + $0x48] sm:$0xf]  ;;  %v1060_v35 = vld [vmem:[%s1617_s2 + $0x50] sm:$0xf0]  ;;  %v1321_v36 = vor.u32 %v1062_v29, %v984_v30  ;;  %v1324_v37 = vor.u32 %v1064_v33, %v990_v32  ;;  %v1059_v38 = vld [vmem:[%s1617_s2 + $0x4c] sm:$0xf] }
  0x17   : > { %v972_v39 = vld [vmem:[%s1617_s2 + $0x54] sm:$0xf0]  ;;  %v1337_v40 = vor.u32 %v1060_v35, %v970_v34  ;;  %v978_v41 = vld [vmem:[%s1617_s2 + $0x50] sm:$0xf]  ;;  %v1061_v42 = vld [vmem:[%s1617_s2 + $0x58] sm:$0xf0] }
  0x18   : > { %427 = vmatpush.bf16.msra.mxu2 %v1268_v19  ;;  %s1632_s16 = smov (!%p218_p5, %s1140_s16), 1  ;;  %v958_v43 = vld [vmem:[%s1617_s2 + $0x30] sm:$0xf]  ;;  %v1057_v44 = vld [vmem:[%s1617_s2 + $0x38] sm:$0xf0]  ;;  %v1353_v45 = vor.u32 %v1059_v38, %v972_v39  ;;  %v1356_v46 = vor.u32 %v1061_v42, %v978_v41  ;;  %s1634_s10 = smov (!%p1332_p6, %s926_s10), 7 }
  0x19   : > { %402 = vmatpush.bf16.msra.mxu0 %v1277_v22  ;;  %v1056_v47 = vld [vmem:[%s1617_s2 + $0x34] sm:$0xf]  ;;  %v960_v48 = vld [vmem:[%s1617_s2 + $0x3c] sm:$0xf0]  ;;  %v1367_v49 = vor.u32 %v1057_v44, %v958_v43  ;;  %s927_s8 = sshll.u32 %s1632_s16, 3  ;;  %vm445_vm0 = vcmask 1041408  }
  0x1a   : > { %415 = vmatpush.bf16.msra.mxu1 %v1292_v27  ;;  %v966_v50 = vld [vmem:[%s1617_s2 + $0x38] sm:$0xf]  ;;  %v1058_v51 = vld [vmem:[%s1617_s2 + $0x40] sm:$0xf0]  ;;  %v1382_v54 = vor.u32 %v1056_v47, %v960_v48  ;;  %s1385_s16 = sadd.s32 %s927_s8, %s1634_s10  ;;  %v1053_v56 = vld [vmem:[%s1617_s2 + $0x1c] sm:$0xf] }
  0x1b   : > { %v946_v52 = vld [vmem:[%s1617_s2 + $0x18] sm:$0xf]  ;;  %v1054_v53 = vld [vmem:[%s1617_s2 + $0x20] sm:$0xf0]  ;;  %v1387_v55 = vor.u32 %v1058_v51, %v966_v50  ;;  %v948_v57 = vld [vmem:[%s1617_s2 + $0x24] sm:$0xf0] }
  0x1c   : > { %428 = vmatpush.bf16.msra.mxu2 %v1295_v28  ;;  %v1396_v58 = vor.u32 %v1054_v53, %v946_v52  ;;  %v954_v59 = vld [vmem:[%s1617_s2 + $0x20] sm:$0xf]  ;;  %v1055_v60 = vld [vmem:[%s1617_s2 + $0x28] sm:$0xf0]  ;;  %s928_s9 = sshll.u32 %s1385_s16, 1  ;;  %v1412_v63 = vor.u32 %v1053_v56, %v948_v57  ;;  %vm441_vm1 = vcmask 31744  }
  0x1d   : > { %403 = vmatpush.bf16.msra.mxu0 %v1304_v31  ;;  %v934_v61 = vld [vmem:[%s1617_s2] sm:$0xf]  ;;  %v1051_v62 = vld [vmem:[%s1617_s2 + $0x8] sm:$0xf0]  ;;  %v1415_v0 = vor.u32 %v1055_v60, %v954_v59  ;;  %v1050_v1 = vld [vmem:[%s1617_s2 + $0x4] sm:$0xf]  ;;  %s1429_s22 = scalar_lea.vmem %s1615_s0, %s928_s9 }
  0x1e   : > { %416 = vmatpush.bf16.msra.mxu1 %v1321_v36  ;;  %v936_v2 = vld [vmem:[%s1617_s2 + $0xc] sm:$0xf0]  ;;  %v1424_v4 = vor.u32 %v1051_v62, %v934_v61  ;;  %v942_v5 = vld [vmem:[%s1617_s2 + $0x8] sm:$0xf]  ;;  %v1052_v6 = vld [vmem:[%s1617_s2 + $0x10] sm:$0xf0] }
  0x1f   : > { %v1438_v7 = vor.u32 %v1050_v1, %v936_v2  ;;  %v271_v9 = vld [vmem:[%s1429_s22] sm:$0x3]  ;;  %v1443_v10 = vor.u32 %v1052_v6, %v942_v5  ;;  %v510_v12 = vld [vmem:[%s1429_s22 + $0x2] sm:$0x3]  ;;  %v1488_v14 = vld [vmem:[%s1429_s22 + $0x4] sm:$0x3] }
  0x20   : > { %429 = vmatpush.bf16.msra.mxu2 %v1324_v37  ;;  %v1029_v30 = vld [vmem:[%s1616_s1 + $0x4] sm:$0xf]  ;;  %v1031_v38 = vld [vmem:[%s1616_s1 + $0x8] sm:$0xf]  ;;  %v658_v56 = vld [vmem:[%s1616_s1] sm:$0xf] }
  0x21   : > { %404 = vmatpush.bf16.msra.mxu0 %v1337_v40  ;;  %v1036_v47 = vld [vmem:[%s1616_s1 + $0x8] sm:$0xf]  ;;  %v724_v52 = vld [vmem:[%s1429_s22 + $0x6] sm:$0x3]  ;;  %s931_s26 = sshll.u32 %s1385_s16, 3 }
  0x22   : > { %417 = vmatpush.bf16.msra.mxu1 %v1353_v45  ;;  %v1034_v57 = vld [vmem:[%s1616_s1 + $0x4] sm:$0xf]  ;;  %s1574_s29 = scalar_lea.vmem %s1619_s4, %s931_s26 }
  0x23   : > { %v1039_v1 = vld [vmem:[%s1616_s1 + $0x4] sm:$0xf] }
  0x24   : > { %430 = vmatpush.bf16.msra.mxu2 %v1356_v46 }
  0x25   : > { %405 = vmatpush.bf16.msra.mxu0 %v1367_v49 }
  0x26   : > { %418 = vmatpush.bf16.msra.mxu1 %v1382_v54 }
  0x28   : > { %431 = vmatpush.bf16.msra.mxu2 %v1387_v55 }
  0x29   : > { %406 = vmatpush.bf16.msra.mxu0 %v1396_v58 }
  0x2a   : > { %419 = vmatpush.bf16.msra.mxu1 %v1412_v63 }
  0x2c   : > { %432 = vmatpush.bf16.msra.mxu2 %v1415_v0 }
  0x2d   : > { %407 = vmatpush.bf16.msra.mxu0 %v1424_v4 }
  0x2e   : > { %420 = vmatpush.bf16.msra.mxu1 %v1438_v7 }
  0x30   : > { %408 = vmatmul.bf16.vlgmr.msra.gmra.mxu0 %v271_v9  ;;  %433 = vmatpush.bf16.msra.mxu2 %v1443_v10 }
  0x31   : > { %511 = vmatpush.bf16.msrb.mxu0 %v1222_v3  ;;  %421 = vmatmul.bf16.vlgmr.msra.gmra.mxu1 %v271_v9 }
  0x32   : > { %524 = vmatpush.bf16.msrb.mxu1 %v1245_v11 }
  0x33   : > { %434 = vmatmul.bf16.vlgmr.msra.gmra.mxu2 %v271_v9 }
  0x34   : > { %537 = vmatpush.bf16.msrb.mxu2 %v1250_v13 }
  0x35   : > { %512 = vmatpush.bf16.msrb.mxu0 %v1237_v8 }
  0x36   : > { %525 = vmatpush.bf16.msrb.mxu1 %v1262_v17 }
  0x38   : > { %538 = vmatpush.bf16.msrb.mxu2 %v1268_v19 }
  0x39   : > { %513 = vmatpush.bf16.msrb.mxu0 %v1277_v22 }
  0x3a   : > { %526 = vmatpush.bf16.msrb.mxu1 %v1292_v27 }
  0x3c   : > { %539 = vmatpush.bf16.msrb.mxu2 %v1295_v28 }
  0x3d   : > { %514 = vmatpush.bf16.msrb.mxu0 %v1304_v31 }
  0x3e   : > { %527 = vmatpush.bf16.msrb.mxu1 %v1321_v36 }
  0x40   : > { %540 = vmatpush.bf16.msrb.mxu2 %v1324_v37 }
  0x41   : > { %515 = vmatpush.bf16.msrb.mxu0 %v1337_v40 }
  0x42   : > { %528 = vmatpush.bf16.msrb.mxu1 %v1353_v45 }
  0x44   : > { %541 = vmatpush.bf16.msrb.mxu2 %v1356_v46 }
  0x45   : > { %516 = vmatpush.bf16.msrb.mxu0 %v1367_v49 }
  0x46   : > { %529 = vmatpush.bf16.msrb.mxu1 %v1382_v54 }
  0x48   : > { %542 = vmatpush.bf16.msrb.mxu2 %v1387_v55 }
  0x49   : > { %517 = vmatpush.bf16.msrb.mxu0 %v1396_v58 }
  0x4a   : > { %530 = vmatpush.bf16.msrb.mxu1 %v1412_v63 }
  0x4c   : > { %543 = vmatpush.bf16.msrb.mxu2 %v1415_v0 }
  0x4d   : > { %518 = vmatpush.bf16.msrb.mxu0 %v1424_v4 }
  0x4e   : > { %531 = vmatpush.bf16.msrb.mxu1 %v1438_v7 }
  0x50   : > { %544 = vmatpush.bf16.msrb.mxu2 %v1443_v10  ;;  %519 = vmatmul.bf16.vlgmr.msrb.gmra.mxu0 %v510_v12 }
  0x51   : > { %532 = vmatmul.bf16.vlgmr.msrb.gmra.mxu1 %v510_v12 }
  0x52   : > { %618 = vmatpush.bf16.msra.mxu1 %v1222_v3 }
  0x53   : > { %545 = vmatmul.bf16.vlgmr.msrb.gmra.mxu2 %v510_v12 }
  0x54   : > { %631 = vmatpush.bf16.msra.mxu2 %v1245_v11 }
  0x56   : > { %619 = vmatpush.bf16.msra.mxu1 %v1237_v8 }
  0x58   : > { %632 = vmatpush.bf16.msra.mxu2 %v1262_v17 }
  0x5a   : > { %620 = vmatpush.bf16.msra.mxu1 %v1277_v22 }
  0x5c   : > { %633 = vmatpush.bf16.msra.mxu2 %v1292_v27 }
  0x5e   : > { %621 = vmatpush.bf16.msra.mxu1 %v1304_v31 }
  0x60   : > { %634 = vmatpush.bf16.msra.mxu2 %v1321_v36 }
  0x62   : > { %622 = vmatpush.bf16.msra.mxu1 %v1337_v40 }
  0x64   : > { %635 = vmatpush.bf16.msra.mxu2 %v1353_v45 }
  0x66   : > { %623 = vmatpush.bf16.msra.mxu1 %v1367_v49 }
  0x68   : > { %636 = vmatpush.bf16.msra.mxu2 %v1382_v54 }
  0x6a   : > { %624 = vmatpush.bf16.msra.mxu1 %v1396_v58 }
  0x6c   : > { %637 = vmatpush.bf16.msra.mxu2 %v1412_v63 }
  0x6e   : > { %625 = vmatpush.bf16.msra.mxu1 %v1424_v4 }
  0x70   : > { %638 = vmatpush.bf16.msra.mxu2 %v1438_v7 }
  0x71   : > { %626 = vmatmul.bf16.vlgmr.msra.gmra.mxu1 %v1488_v14 }
  0x73   : > { %639 = vmatmul.bf16.vlgmr.msra.gmra.mxu2 %v1488_v14 }
  0x74   : > { %725 = vmatpush.bf16.msrb.mxu2 %v1222_v3 }
  0x78   : > { %726 = vmatpush.bf16.msrb.mxu2 %v1237_v8  ;;  %v440_v8 = vld [vmem:[%s1616_s1] sm:$0xf] }
  0x7c   : > { %727 = vmatpush.bf16.msrb.mxu2 %v1277_v22 }
  0x80   : > { %728 = vmatpush.bf16.msrb.mxu2 %v1304_v31 }
  0x84   : > { %729 = vmatpush.bf16.msrb.mxu2 %v1337_v40 }
  0x88   : > { %730 = vmatpush.bf16.msrb.mxu2 %v1367_v49  ;;  %v551_v49 = vld [vmem:[%s1616_s1] sm:$0xf] }
  0x8c   : > { %731 = vmatpush.bf16.msrb.mxu2 %v1396_v58 }
  0x90   : > { %732 = vmatpush.bf16.msrb.mxu2 %v1424_v4 }
  0x93   : > { %733 = vmatmul.bf16.vlgmr.msrb.gmra.mxu2 %v724_v52 }
  0xad   : > { %v409_v15 = vpop.f32.mrf.mxu0 }
  0xae   : > { %v439_v16 = vpack.c.bf16 %v409_v15, %v409_v15  ;;  %v422_v3 = vpop.f32.mrf.mxu1 }
  0xaf   : > { %v463_v20 = vpack.c.bf16 %v422_v3, %v422_v3 }
  0xb0   : > { %v447_v18 = vsel %vm445_vm0, %v439_v16, 0 }
  0xb1   : > { %456 = vmatpush.bf16.msra.mxu3 %v447_v18  ;;  %v470_v21 = vsel %vm445_vm0, %v463_v20, 0 }
  0xb4   : > { %1028 = vmatmul.msk.bf16.vlgmr.msra.gmra.mxu3 %vm441_vm1, %v440_v8 }
  0xb5   : > { %479 = vmatpush.bf16.msrb.mxu3 %v470_v21  ;;  %v411_v22 = vpop.f32.mrf.mxu0 }
  0xb6   : > { %v424_v23 = vpop.f32.mrf.mxu1  ;;  %v435_v24 = vpop.f32.mrf.mxu2 }
  0xb7   : > { %v486_v25 = vpack.c.bf16 %v435_v24, %v435_v24  ;;  %v1041_v24 = vld [vmem:[%s1616_s1 + $0x8] sm:$0xf] }
  0xb9   : > { %v493_v26 = vsel %vm445_vm0, %v486_v25, 0 }
  0xba   : > { %502 = vmatpush.bf16.msra.mxu3 %v493_v26 }
  0xbe   : > { %v437_v29 = vpop.f32.mrf.mxu2 }
  0xc4   : > { %1030 = vmatmul.msk.bf16.vlgmr.msrb.gmra.mxu3 %vm441_vm1, %v1029_v30 }
  0xcd   : > { %v520_v31 = vpop.f32.mrf.mxu0 }
  0xce   : > { %v550_v32 = vpack.c.bf16 %v520_v31, %v520_v31  ;;  %v533_v33 = vpop.f32.mrf.mxu1  ;;  %v1046_v31 = vld [vmem:[%s1616_s1 + $0x8] sm:$0xf] }
  0xcf   : > { %v572_v35 = vpack.c.bf16 %v533_v33, %v533_v33  ;;  %v765_v33 = vld [vmem:[%s1616_s1] sm:$0xf] }
  0xd0   : > { %v556_v34 = vsel %vm445_vm0, %v550_v32, 0 }
  0xd1   : > { %565 = vmatpush.bf16.msrb.mxu3 %v556_v34  ;;  %v578_v39 = vsel %vm445_vm0, %v572_v35, 0 }
  0xd4   : > { %1032 = vmatmul.msk.bf16.vlgmr.msra.gmra.mxu3 %vm441_vm1, %v1031_v38 }
  0xd5   : > { %v522_v40 = vpop.f32.mrf.mxu0  ;;  %587 = vmatpush.bf16.msra.mxu3 %v578_v39  ;;  %v1044_v39 = vld [vmem:[%s1616_s1 + $0x4] sm:$0xf] }
  0xd6   : > { %v546_v41 = vpop.f32.mrf.mxu2  ;;  %v535_v42 = vpop.f32.mrf.mxu1 }
  0xd7   : > { %v594_v43 = vpack.c.bf16 %v546_v41, %v546_v41 }
  0xd9   : > { %v600_v44 = vsel %vm445_vm0, %v594_v43, 0 }
  0xda   : > { %609 = vmatpush.bf16.msra.mxu0 %v600_v44 }
  0xdd   : > { %1037 = vmatmul.msk.bf16.vlgmr.msra.gmra.mxu0 %vm441_vm1, %v1036_v47 }
  0xde   : > { %v548_v48 = vpop.f32.mrf.mxu2 }
  0xe4   : > { %1033 = vmatmul.msk.bf16.vlgmr.msrb.gmra.mxu3 %vm441_vm1, %v551_v49 }
  0xe5   : > { %644 = vmatpush.bf16.msrb.mxu3 %v1250_v13 }
  0xe9   : > { %645 = vmatpush.bf16.msrb.mxu3 %v1268_v19 }
  0xed   : > { %646 = vmatpush.bf16.msrb.mxu3 %v1295_v28 }
  0xee   : > { %v627_v50 = vpop.f32.mrf.mxu1 }
  0xef   : > { %v657_v51 = vpack.c.bf16 %v627_v50, %v627_v50 }
  0xf1   : > { %v663_v53 = vsel %vm445_vm0, %v657_v51, 0  ;;  %647 = vmatpush.bf16.msrb.mxu3 %v1324_v37 }
  0xf2   : > { %672 = vmatpush.bf16.msrb.mxu0 %v663_v53 }
  0xf4   : > { %1035 = vmatmul.msk.bf16.vlgmr.msra.gmra.mxu3 %vm441_vm1, %v1034_v57 }
  0xf5   : > { %1038 = vmatmul.msk.bf16.vlgmr.msrb.gmra.mxu0 %vm441_vm1, %v658_v56  ;;  %648 = vmatpush.bf16.msrb.mxu3 %v1356_v46 }
  0xf6   : > { %v640_v58 = vpop.f32.mrf.mxu2  ;;  %v629_v59 = vpop.f32.mrf.mxu1 }
  0xf7   : > { %v679_v60 = vpack.c.bf16 %v640_v58, %v640_v58 }
  0xf9   : > { %v685_v61 = vsel %vm445_vm0, %v679_v60, 0  ;;  %649 = vmatpush.bf16.msrb.mxu3 %v1387_v55 }
  0xfa   : > { %694 = vmatpush.bf16.msra.mxu0 %v685_v61 }
  0xfd   : > { %650 = vmatpush.bf16.msrb.mxu3 %v1415_v0 }
  0xfe   : > { %751 = vmatpush.bf16.msrb.mxu0 %v1250_v13  ;;  %v642_v62 = vpop.f32.mrf.mxu2 }
 0x101   : > { %651 = vmatpush.bf16.msrb.mxu3 %v1443_v10 }
 0x102   : > { %752 = vmatpush.bf16.msrb.mxu0 %v1268_v19 }
 0x104   : > { %652 = vmatmul.bf16.vlgmr.msrb.gmra.mxu3 %v1488_v14 }
 0x105   : > { %1040 = vmatmul.msk.bf16.vlgmr.msra.gmra.mxu0 %vm441_vm1, %v1039_v1  ;;  %738 = vmatpush.bf16.msra.mxu3 %v1245_v11 }
 0x106   : > { %753 = vmatpush.bf16.msrb.mxu0 %v1295_v28 }
 0x109   : > { %739 = vmatpush.bf16.msra.mxu3 %v1262_v17 }
 0x10a   : > { %754 = vmatpush.bf16.msrb.mxu0 %v1324_v37 }
 0x10d   : > { %740 = vmatpush.bf16.msra.mxu3 %v1292_v27  ;;  %v270_v27 = vld [vmem:[%s1618_s3] sm:$0xff] }
 0x10e   : > { %755 = vmatpush.bf16.msrb.mxu0 %v1356_v46 }
 0x111   : > { %741 = vmatpush.bf16.msra.mxu3 %v1321_v36 }
 0x112   : > { %756 = vmatpush.bf16.msrb.mxu0 %v1387_v55 }
 0x115   : > { %742 = vmatpush.bf16.msra.mxu3 %v1353_v45 }
 0x116   : > { %757 = vmatpush.bf16.msrb.mxu0 %v1415_v0  ;;  %v734_v4 = vpop.f32.mrf.mxu2 }
 0x117   : > { %v764_v18 = vpack.c.bf16 %v734_v4, %v734_v4 }
 0x119   : > { %743 = vmatpush.bf16.msra.mxu3 %v1382_v54  ;;  %v770_v22 = vsel %vm445_vm0, %v764_v18, 0 }
 0x11a   : > { %758 = vmatpush.bf16.msrb.mxu0 %v1443_v10 }
 0x11d   : > { %759 = vmatmul.bf16.vlgmr.msrb.gmra.mxu0 %v724_v52  ;;  %744 = vmatpush.bf16.msra.mxu3 %v1412_v63 }
 0x11e   : > { %v736_v9 = vpop.f32.mrf.mxu2 }
 0x121   : > { %745 = vmatpush.bf16.msra.mxu3 %v1438_v7 }
 0x124   : > { %746 = vmatmul.bf16.vlgmr.msra.gmra.mxu3 %v724_v52 }
 0x137   : > { %v458_v11 = vpop.f32.mrf.mxu3 }
 0x138   : > { %v462_v28 = vadd.f32 %v458_v11, %v270_v27 }
 0x13f   : > { %v460_v13 = vpop.f32.mrf.mxu3 }
 0x147   : > { %v481_v17 = vpop.f32.mrf.mxu3 }
 0x148   : > { %v485_v36 = vadd.f32 %v481_v17, %v462_v28 }
 0x14f   : > { %v483_v19 = vpop.f32.mrf.mxu3 }
 0x157   : > { %v504_v37 = vpop.f32.mrf.mxu3 }
 0x158   : > { %v508_v45 = vadd.f32 %v504_v37, %v485_v36 }
 0x15a   : > { %v611_v46 = vpop.f32.mrf.mxu0  ;;  %509 = vst [vmem:[%s1574_s29] sm:$0xff] %v508_v45 }
 0x15f   : > { %v506_v54 = vpop.f32.mrf.mxu3 }
 0x162   : > { %v613_v55 = vpop.f32.mrf.mxu0 }
 0x167   : > { %v567_v63 = vpop.f32.mrf.mxu3 }
 0x168   : > { %v571_v6 = vadd.f32 %v567_v63, %v270_v27 }
 0x16f   : > { %v569_v2 = vpop.f32.mrf.mxu3 }
 0x172   : > { %v674_v0 = vpop.f32.mrf.mxu0 }
 0x173   : > { %v678_v12 = vadd.f32 %v674_v0, %v270_v27 }
 0x177   : > { %v589_v7 = vpop.f32.mrf.mxu3 }
 0x178   : > { %v593_v10 = vadd.f32 %v589_v7, %v571_v6 }
 0x17a   : > { %v676_v5 = vpop.f32.mrf.mxu0  ;;  %v615_v14 = vadd.f32 %v611_v46, %v593_v10 }
 0x17c   : > { %616 = vst [vmem:[%s1574_s29 + $0x8] sm:$0xff] %v615_v14 }
 0x17f   : > { %v591_v3 = vpop.f32.mrf.mxu3 }
 0x182   : > { %v696_v15 = vpop.f32.mrf.mxu0 }
 0x183   : > { %v700_v16 = vadd.f32 %v696_v15, %v678_v12 }
 0x187   : > { %v653_v8 = vpop.f32.mrf.mxu3 }
 0x188   : > { %v701_v21 = vpack.c.bf16 %v653_v8, %v653_v8 }
 0x18a   : > { %v698_v20 = vpop.f32.mrf.mxu0  ;;  %v707_v23 = vsel %vm445_vm0, %v701_v21, 0 }
 0x18b   : > { %716 = vmatpush.bf16.msrb.mxu1 %v707_v23 }
 0x18e   : > { %1042 = vmatmul.msk.bf16.vlgmr.msrb.gmra.mxu1 %vm441_vm1, %v1041_v24 }
 0x18f   : > { %779 = vmatpush.bf16.msra.mxu1 %v770_v22  ;;  %v655_v25 = vpop.f32.mrf.mxu3 }
 0x19a   : > { %v760_v26 = vpop.f32.mrf.mxu0 }
 0x19b   : > { %v808_v29 = vpack.c.bf16 %v760_v26, %v760_v26 }
 0x19d   : > { %v814_v30 = vsel %vm445_vm0, %v808_v29, 0 }
 0x19e   : > { %823 = vmatpush.bf16.msra.mxu2 %v814_v30  ;;  %1043 = vmatmul.msk.bf16.vlgmr.msra.gmra.mxu1 %vm441_vm1, %v765_v33 }
 0x1a1   : > { %1047 = vmatmul.msk.bf16.vlgmr.msra.gmra.mxu2 %vm441_vm1, %v1046_v31 }
 0x1a2   : > { %v762_v32 = vpop.f32.mrf.mxu0 }
 0x1a7   : > { %v747_v34 = vpop.f32.mrf.mxu3 }
 0x1a8   : > { %v786_v35 = vpack.c.bf16 %v747_v34, %v747_v34 }
 0x1aa   : > { %v792_v38 = vsel %vm445_vm0, %v786_v35, 0 }
 0x1ab   : > { %801 = vmatpush.bf16.msrb.mxu1 %v792_v38 }
 0x1ae   : > { %1045 = vmatmul.msk.bf16.vlgmr.msrb.gmra.mxu1 %vm441_vm1, %v1044_v39 }
 0x1af   : > { %v749_v40 = vpop.f32.mrf.mxu3 }
 0x20b   : > { %v718_v41 = vpop.f32.mrf.mxu1 }
 0x20c   : > { %v722_v42 = vadd.f32 %v718_v41, %v700_v16 }
 0x20e   : > { %723 = vst [vmem:[%s1574_s29 + $0x10] sm:$0xff] %v722_v42 }
 0x213   : > { %v720_v43 = vpop.f32.mrf.mxu1 }
 0x21b   : > { %v781_v44 = vpop.f32.mrf.mxu1 }
 0x21c   : > { %v785_v50 = vadd.f32 %v781_v44, %v270_v27 }
 0x223   : > { %v783_v48 = vpop.f32.mrf.mxu1 }
 0x224   : > { %v825_v47 = vpop.f32.mrf.mxu2 }
 0x22b   : > { %v803_v51 = vpop.f32.mrf.mxu1 }
 0x22c   : > { %v827_v49 = vpop.f32.mrf.mxu2  ;;  %v807_v52 = vadd.f32 %v803_v51, %v785_v50 }
 0x22e   : > { %v829_v53 = vadd.f32 %v825_v47, %v807_v52 }
 0x230   : > { %830 = vst [vmem:[%s1574_s29 + $0x18] sm:$0xff] %v829_v53 }
 0x233   : > { %v805_v56 = vpop.f32.mrf.mxu1 }
 0x234 PF: > { %s14_s19 = sadd.s32 1, %s1152_s19   ;;  %s1621_s15 = smov %s1144_s17 }
 0x235   : > { %p11_p7 = scmp.ge.s32.totalorder %s14_s19, 6   ;;  %s1622_s16 = smov %s1148_s18 }
 0x236   : > { %s1623_s17 = smov %s1626_s20  ;;  %s1624_s18 = smov %s1630_s21 }
 0x237   :  { %13 = sbr.rel (!%p11_p7) target bundleno = 3 (0x3), region = 68 }

</bundles_post_ra>
